<compile_context>
chip_gen: v7x
topology: tpu7x:2x2x1
jax: 0.10.0
libtpu: 0.0.40
codegen_flags: <defaults>
</compile_context>

<pallas_src>
import functools

import jax
import jax.numpy as jnp
from jax.experimental import pallas as pl
from jax.experimental.pallas import tpu as pltpu


def _layernorm_kernel(x_ref, scale_ref, shift_ref, o_ref, *, epsilon):
    # x_ref: (row_tile, D) tile; scale_ref / shift_ref: (1, D), broadcast over rows.
    x = x_ref[...].astype(jnp.float32)
    scale = scale_ref[...].astype(jnp.float32)
    shift = shift_ref[...].astype(jnp.float32)

    d = x.shape[-1]
    inv_d = 1.0 / float(d)

    # Single traversal: sum and sum-of-squares; population variance.
    s = jnp.sum(x, axis=-1, keepdims=True)
    sq = jnp.sum(x * x, axis=-1, keepdims=True)
    mean = s * inv_d
    var = jnp.maximum(sq * inv_d - mean * mean, 0.0)  # clamp guards cancellation

    x_norm = (x - mean) * jax.lax.rsqrt(var + epsilon)
    out = (x_norm + shift) * scale
    o_ref[...] = out.astype(o_ref.dtype)


def _round_up(a, b):
    return (a + b - 1) // b * b


def layer_norm(x, scale, shift, epsilon=1e-07):
    """x: (..., D); scale, shift: (D,). Returns ((x-mean)/sqrt(var+eps) + shift) * scale."""
    orig_shape = x.shape
    D = orig_shape[-1]
    x2 = x.reshape(-1, D)
    R = x2.shape[0]

    itemsize = jnp.dtype(x.dtype).itemsize
    # Sublane packing alignment: f32 -> 8 rows, bf16 -> 16, int8/fp8 -> 32.
    row_align = 8 * max(1, 4 // itemsize)

    # Size the row tile purely by bytes (~4 MiB per x block), sublane-aligned.
    # Mem-bound kernel: big blocks amortize ~0.35 us per-grid-step overhead and
    # keep stores lane-dense / unmasked (D is a multiple of 128 for GPT widths).
    target_block_bytes = 4 * 1024 * 1024
    row_bytes = D * itemsize
    row_tile = max(row_align, (target_block_bytes // row_bytes) // row_align * row_align)

    # Guarantee >= 2 grid steps where possible so the "parallel" axis shards
    # across both TensorCores on v7x (no effect on v5e/v6e, 1 TC).
    if R <= row_tile:
        row_tile = max(row_align, _round_up(pl.cdiv(R, 2), row_align))

    grid_rows = pl.cdiv(R, row_tile)  # ragged last block is masked by Pallas

    kernel = functools.partial(_layernorm_kernel, epsilon=float(epsilon))

    # VMEM budget: double-buffered x block + double-buffered out block, plus the
    # f32 intermediates (~3 full-tile f32 arrays) around the cross-lane reductions,
    # plus resident scale/shift and margin.  Stay <= 48 MiB (v7x physical VMEM is 64 MiB).
    block_bytes = row_tile * D * itemsize
    f32_tmp_bytes = 3 * row_tile * D * 4
    needed = 4 * block_bytes + f32_tmp_bytes + 2 * D * 4 + (2 << 20)
    vmem_limit_bytes = int(min(48 << 20, max(needed, 16 << 20)))

    out = pl.pallas_call(
        kernel,
        out_shape=jax.ShapeDtypeStruct((R, D), x.dtype),
        grid_spec=pl.GridSpec(
            grid=(grid_rows,),
            in_specs=[
                pl.BlockSpec((row_tile, D), lambda i: (i, 0)),
                # Constant index_map -> scale/shift DMA'd once, resident across steps.
                pl.BlockSpec((1, D), lambda i: (0, 0)),
                pl.BlockSpec((1, D), lambda i: (0, 0)),
            ],
            out_specs=pl.BlockSpec((row_tile, D), lambda i: (i, 0)),
        ),
        compiler_params=pltpu.CompilerParams(
            dimension_semantics=("parallel",),
            vmem_limit_bytes=vmem_limit_bytes,
        ),
    )(x2, scale.reshape(1, D), shift.reshape(1, D))

    return out.reshape(orig_shape)


def _reference(x, scale, shift, epsilon=1e-07):
    mean = jnp.mean(x, axis=-1, keepdims=True)
    var = jnp.mean((x - mean) ** 2, axis=-1, keepdims=True)
    return ((x - mean) / jnp.sqrt(var + epsilon) + shift) * scale


if __name__ == "__main__":
    key = jax.random.PRNGKey(0)

    # Small GPT2-like config: emb_dim = config['emb_dim'].
    batch, seq, emb_dim = 2, 8, 128
    k1, k2 = jax.random.split(key, 2)
    x = jax.random.normal(k1, (batch, seq, emb_dim), dtype=jnp.float32)

    # Parameters per the module's __init__: scale = ones(emb_dim), shift = zeros(emb_dim).
    scale = jnp.ones((emb_dim,), dtype=jnp.float32)
    shift = jnp.zeros((emb_dim,), dtype=jnp.float32)

    out = layer_norm(x, scale, shift, epsilon=1e-07)
    out = jax.block_until_ready(out)
    ref = _reference(x, scale, shift, epsilon=1e-07)
    assert jnp.allclose(out, ref, atol=1e-5, rtol=1e-5), "mismatch vs reference (case 1)"

    # Second case: non-tile-aligned row count (exercises the ragged last-block
    # path, no pad/slice) and non-trivial scale/shift.
    batch2, seq2 = 3, 5
    x2 = jax.random.normal(k2, (batch2, seq2, emb_dim), dtype=jnp.float32)
    scale2 = 0.5 + jax.random.uniform(k1, (emb_dim,), dtype=jnp.float32)
    shift2 = jax.random.normal(k2, (emb_dim,), dtype=jnp.float32) * 0.1
    out2 = layer_norm(x2, scale2, shift2, epsilon=1e-07)
    out2 = jax.block_until_ready(out2)
    ref2 = _reference(x2, scale2, shift2, epsilon=1e-07)
    assert jnp.allclose(out2, ref2, atol=1e-5, rtol=1e-5), "mismatch vs reference (case 2)"

    print("KERNEL_OK")
</pallas_src>

<mosaic_0001>
module attributes {stable_mosaic.version = 11 : i64} {
  func.func @_layernorm_kernel(%arg0: i32, %arg1: memref<8x128xf32, #tpu.memory_space<vmem>>, %arg2: memref<1x128xf32, #tpu.memory_space<vmem>>, %arg3: memref<1x128xf32, #tpu.memory_space<vmem>>, %arg4: memref<8x128xf32, #tpu.memory_space<vmem>>) attributes {dimension_semantics = [#tpu.dimension_semantics<parallel>], iteration_bounds = array<i64: 2>, scalar_prefetch = 0 : i64, scratch_operands = 0 : i64, tpu.core_type = #tpu.core_type<tc>, window_params = [{transform_indices = @transform_0, window_bounds = array<i64: 8, 128>}, {pipeline_mode = #tpu.pipeline_mode<synchronous>, transform_indices = @transform_1, window_bounds = array<i64: 1, 128>}, {pipeline_mode = #tpu.pipeline_mode<synchronous>, transform_indices = @transform_2, window_bounds = array<i64: 1, 128>}, {transform_indices = @transform_3, window_bounds = array<i64: 8, 128>}]} {
    %c0 = arith.constant 0 : index
    %c0_0 = arith.constant 0 : index
    %0 = vector.load %arg1[%c0, %c0_0] : memref<8x128xf32, #tpu.memory_space<vmem>>, vector<8x128xf32>
    %c0_1 = arith.constant 0 : index
    %c0_2 = arith.constant 0 : index
    %1 = vector.load %arg2[%c0_1, %c0_2] : memref<1x128xf32, #tpu.memory_space<vmem>>, vector<1x128xf32>
    %c0_3 = arith.constant 0 : index
    %c0_4 = arith.constant 0 : index
    %2 = vector.load %arg3[%c0_3, %c0_4] : memref<1x128xf32, #tpu.memory_space<vmem>>, vector<1x128xf32>
    %cst = arith.constant dense<0.000000e+00> : vector<8xf32>
    %3 = vector.multi_reduction <add>, %0, %cst [1] : vector<8x128xf32> to vector<8xf32>
    %4 = vector.shape_cast %3 : vector<8xf32> to vector<8x1xf32>
    %5 = arith.mulf %0, %0 : vector<8x128xf32>
    %cst_5 = arith.constant dense<0.000000e+00> : vector<8xf32>
    %6 = vector.multi_reduction <add>, %5, %cst_5 [1] : vector<8x128xf32> to vector<8xf32>
    %7 = vector.shape_cast %6 : vector<8xf32> to vector<8x1xf32>
    %cst_6 = arith.constant 7.812500e-03 : f32
    %8 = vector.broadcast %cst_6 : f32 to vector<8x1xf32>
    %9 = arith.mulf %4, %8 : vector<8x1xf32>
    %cst_7 = arith.constant 7.812500e-03 : f32
    %10 = vector.broadcast %cst_7 : f32 to vector<8x1xf32>
    %11 = arith.mulf %7, %10 : vector<8x1xf32>
    %12 = arith.mulf %9, %9 : vector<8x1xf32>
    %13 = arith.subf %11, %12 : vector<8x1xf32>
    %cst_8 = arith.constant 0.000000e+00 : f32
    %14 = vector.broadcast %cst_8 : f32 to vector<8x1xf32>
    %15 = arith.maximumf %13, %14 : vector<8x1xf32>
    %16 = vector.broadcast %9 : vector<8x1xf32> to vector<8x128xf32>
    %17 = arith.subf %0, %16 : vector<8x128xf32>
    %cst_9 = arith.constant 1.000000e-07 : f32
    %18 = vector.broadcast %cst_9 : f32 to vector<8x1xf32>
    %19 = arith.addf %15, %18 : vector<8x1xf32>
    %20 = math.rsqrt %19 : vector<8x1xf32>
    %21 = vector.broadcast %20 : vector<8x1xf32> to vector<8x128xf32>
    %22 = arith.mulf %17, %21 : vector<8x128xf32>
    %23 = vector.broadcast %2 : vector<1x128xf32> to vector<8x128xf32>
    %24 = arith.addf %22, %23 : vector<8x128xf32>
    %25 = vector.broadcast %1 : vector<1x128xf32> to vector<8x128xf32>
    %26 = arith.mulf %24, %25 : vector<8x128xf32>
    %c0_10 = arith.constant 0 : index
    %c0_11 = arith.constant 0 : index
    %27 = vector.load %arg4[%c0_10, %c0_11] : memref<8x128xf32, #tpu.memory_space<vmem>>, vector<8x128xf32>
    tpu.vector_store %arg4[%c0_10, %c0_11], %26 {strides = array<i32>} : memref<8x128xf32, #tpu.memory_space<vmem>>, vector<8x128xf32>,
    return
  }
  func.func @transform_0(%arg0: i32) -> (i32, i32) {
    %c0_i32 = arith.constant 0 : i32
    %c0_i32_0 = arith.constant 0 : i32
    return %arg0, %c0_i32 : i32, i32
  }
  func.func @transform_1(%arg0: i32) -> (i32, i32) {
    %c0_i32 = arith.constant 0 : i32
    %c0_i32_0 = arith.constant 0 : i32
    %c0_i32_1 = arith.constant 0 : i32
    return %c0_i32, %c0_i32_0 : i32, i32
  }
  func.func @transform_2(%arg0: i32) -> (i32, i32) {
    %c0_i32 = arith.constant 0 : i32
    %c0_i32_0 = arith.constant 0 : i32
    %c0_i32_1 = arith.constant 0 : i32
    return %c0_i32, %c0_i32_0 : i32, i32
  }
  func.func @transform_3(%arg0: i32) -> (i32, i32) {
    %c0_i32 = arith.constant 0 : i32
    %c0_i32_0 = arith.constant 0 : i32
    return %arg0, %c0_i32 : i32, i32
  }
}

</mosaic_0001>

<bundles_post_ra>
// kernel: tpu_custom_call.1
= control target key start
LH: loop header
LB: loop body
LE: loop exit
PB: predicated region body
PF: predicated region fallthrough
CT: control target
= control target key end

     0   :  { %8 = vsyncpa [#allocation3], 0  ;;  %s651_s0 = inlined_call_operand.hbm [shape: f32[16,128], index: 0, kind: input, shape index: {}]   ;;  %s652_s1 = inlined_call_operand.vmem [shape: f32[1,128], index: 1, kind: input, shape index: {}]   ;;  %s653_s2 = inlined_call_operand.vmem [shape: f32[1,128], index: 2, kind: input, shape index: {}]   ;;  %s654_s3 = inlined_call_operand.hbm [shape: f32[16,128], index: 3, kind: output, shape index: {}]  }
   0x1   :  { %10 = vsyncpa [#allocation3 + $0x1], 0 }
   0x2   :  { %11 = vsyncpa [#allocation4], 0 }
   0x3   :  { %13 = vsyncpa [#allocation4 + $0x1], 0  ;;  %s484_s12 = smov 0   ;;  %s486_s13 = smov 0  }
   0x4   :  { %s488_s14 = smov 0   ;;  %s490_s15 = smov 0  }
   0x5 LB: > { %s505_s16 = sadd.s32 4294967295, %s460_s15   ;;  %s302_s17 = sadd.s32 4294967294, %s460_s15   ;;  %s460_s15 = sphi %s490_s15, %s669_s15   ;;  %s456_s14 = sphi %s488_s14, %s668_s14   ;;  %s452_s13 = sphi %s486_s13, %s667_s13   ;;  %s448_s12 = sphi %s484_s12, %s666_s12  }
   0x6   : > { %s509_s18 = sadd.s32 1, %s460_s15   ;;  %s26_s19 = sadd.s32 1, %s456_s14 }
   0x7   : > { %s23_s20 = ssub.s32 %s460_s15, %s509_s18  ;;  %p33_p0 = scmp.ne.s32.totalorder %s456_s14, %s452_s13 }
   0x8   : > { %p24_p1 = scmp.eq.s32.totalorder %s23_s20, 0  ;;  %p34_p2 = scmp.eq.s32.totalorder %s460_s15, 0 }
   0x9   : > { %p39_p3 = scmp.ne.s32.totalorder %s452_s13, %s448_s12  ;;  %p40_p4 = scmp.eq.s32.totalorder %s505_s16, 0 }
   0xa   : > { %s521_s21 = scalar_select %p24_p1, %s456_s14, %s26_s19  }
   0xb   : > { %p523_p5 = por %p34_p2, %p33_p0  ;;  %p527_p6 = por %p40_p4, %p39_p3 }
   0xc   : > { %p105_p7 = scmp.eq.s32.totalorder %s505_s16, 1  ;;  %p111_p8 = scmp.eq.s32.totalorder %s302_s17, 1 }
   0xd   : > { %p328_p10 = scmp.lt.s32.totalorder %s460_s15, 2  ;;  %s137_s26 = sand.u32 1, %s456_s14  }
   0xe   : > { %p534_p11 = por %p105_p7, %p33_p0  ;;  %p538_p12 = por %p111_p8, %p39_p3 }
   0xf   : > { %s306_s27 = sshll.u32 %s460_s15, 7  ;;  %s305_s28 = sshll.u32 %s137_s26, 3 }
  0x10   : > { %s658_s24 = scalar_select %p534_p11, 1, 0 }
  0x11   : > { %s659_s25 = scalar_select %p538_p12, 1, 0 }
  0x12   : > { %s547_s4 = scalar_lea.hbm %s651_s0, %s306_s27  ;;  %s141_s5 = scalar_lea.vmem [#allocation2], %s305_s28 }
  0x13   : > { %s148_s6 = sshll.u32 %s141_s5, 4  ;;  %p551_p13 = pnand %p328_p10, %p523_p5  ;;  %s555_s6 = int_to_ptr.vmem [resolvable:$true] %s148_s6 }
  0x14   : > { %s138_s8 = scalar_lea.sflag [#allocation3], %s137_s26  ;;  %s364_s9 = scalar_lea.hbm %s547_s4, 128 }
  0x15   : > { %p365_p2 = scmp.ne.s32.totalorder %s547_s4, %s364_s9  ;;  %p366_p3 = pneg %p551_p13 }
  0x16   : > { %s369_s17 = scalar_lea.hbm %s651_s0, 256  ;;  %p370_p5 = scmp.lt.u32.totalorder %s547_s4, %s651_s0 }
  0x17   : > { %p367_p4 = pnand %p366_p3, %p365_p2  ;;  %p371_p8 = scmp.lt.u32.totalorder %s369_s17, %s364_s9 }
  0x18   : > { %p373_p9 = scmp.lt.u32.totalorder %s364_s9, %s547_s4 }
  0x19   : > { %p368_p7 = pneg %p367_p4  ;;  %p372_p10 = por %p371_p8, %p370_p5 }
  0x1b   : > { %p374_p0 = por %p373_p9, %p372_p10 }
  0x1d   : > { %p375_p1 = pnand %p374_p0, %p368_p7 }
  0x1f   : > { %378 = shalt.err (!%p375_p1)
}
  0x20   : > { %s379_s22 = scalar_lea.vmem %s555_s6, 128  ;;  %s462_s26 = smov [#allocation2]  }
  0x21   : > { %p380_p2 = scmp.ne.s32.totalorder %s555_s6, %s379_s22  ;;  %s384_s27 = sshll.u32 %s462_s26, 4  ;;  %s385_s27 = int_to_ptr.vmem [resolvable:$false] %s384_s27 }
  0x22   : > { %s386_s28 = scalar_lea.vmem %s385_s27, 256  ;;  %p387_p11 = scmp.lt.s32.totalorder %s555_s6, %s385_s27 }
  0x23   : > { %p382_p4 = pnand %p380_p2, %p366_p3  ;;  %p388_p5 = scmp.lt.s32.totalorder %s386_s28, %s379_s22 }
  0x25   : > { %p383_p12 = pneg %p382_p4  ;;  %p389_p8 = por %p388_p5, %p387_p11 }
  0x27   : > { %p390_p9 = pnand %p389_p8, %p383_p12 }
  0x29   : > { %393 = shalt.err (!%p390_p9)
}
  0x2a   : > { %323 = dma.hbm_to_vmem [thread:$0]  (!%p551_p13), %s547_s4, 128, %s555_s6, %s138_s8  }
  0x2b   : > { %p661_p0 = scmp.lt.s32.totalorder %s460_s15, 3  ;;  %p662_p1 = scmp.ge.s32.totalorder %s460_s15, 1 }
  0x2d   : > { %p154_p3 = pnand %p662_p1, %p661_p0 }
  0x2e   : > { %s589_s29 = sand.u32 (!%p154_p3), 1, %s452_s13  }
  0x2f   : > { %157 = sbr.rel (%p154_p3) target bundleno = 241 (0xf1), region = 32  ;;  %s308_s30 = sshll.u32 (!%p154_p3), %s589_s29, 3 }
  0x30   : > { %s160_s5 = scalar_lea.sflag (!%p154_p3), [#allocation3], %s589_s29  ;;  %s163_s9 = scalar_lea.vmem (!%p154_p3), [#allocation2], %s308_s30 }
  0x36   : > { %439 = dma.done.wait (%p527_p6), %s160_s5, 128  }
  0x37   : > { %441 = vsyncadd (%p527_p6), %s160_s5, 4294967168  ;;  %v186_v0 = vld [vmem:[%s163_s9] sm:$0xff]  ;;  %s313_s8 = sshll.u32 %s505_s16, 7  ;;  %s185_s10 = scalar_lea.vmem [#allocation5], %s308_s30 }
  0x38   : > { %189 = vadd.xlane.f32.xlu0 %v186_v0  ;;  %v191_v1 = vmul.f32 %v186_v0, %v186_v0  ;;  %v310_v12 = vld [vmem:[%s653_s2] ss:$0 sm:$0xff]  ;;  %s232_s11 = sshll.u32 %s185_s10, 4  ;;  %s607_s20 = scalar_lea.hbm %s654_s3, %s313_s8  ;;  %s609_s11 = int_to_ptr.vmem [resolvable:$true] %s232_s11 }
  0x39   : > { %v311_v14 = vld [vmem:[%s652_s1] ss:$0 sm:$0xff]  ;;  %s219_s22 = scalar_lea.sflag [#allocation4], %s589_s29  ;;  %s394_s26 = scalar_lea.vmem %s609_s11, 128 }
  0x3a   : > { %p395_p6 = scmp.ne.s32.totalorder %s609_s11, %s394_s26  ;;  %p663_p11 = scmp.ne.s32.totalorder %s658_s24, 0 }
  0x3b   : > { %s463_s16 = smov [#allocation5]  }
  0x3c   : > { %192 = vadd.xlane.f32.xlu0 %v191_v1  ;;  %p396_p12 = pnand %p395_p6, %p663_p11  ;;  %s398_s27 = sshll.u32 %s463_s16, 4  ;;  %s399_s27 = int_to_ptr.vmem [resolvable:$false] %s398_s27 }
  0x3d   : > { %s400_s28 = scalar_lea.vmem %s399_s27, 256  ;;  %p401_p7 = scmp.lt.s32.totalorder %s609_s11, %s399_s27 }
  0x3e   : > { %p397_p13 = pneg %p396_p12  ;;  %p402_p10 = scmp.lt.s32.totalorder %s400_s28, %s394_s26 }
  0x40   : > { %p403_p2 = por %p402_p10, %p401_p7 }
  0x42   : > { %p404_p4 = pnand %p403_p2, %p397_p13 }
  0xc5   : > { %v190_v2 = vpop.xlane.xlu0 %189 }
  0xc6   : > { %v194_v3 = vmul.f32 0.0078125, %v190_v2 }
  0xc8   : > { %v196_v5 = vmul.f32 %v194_v3, %v194_v3  ;;  %v199_v10 = vsub.f32 %v186_v0, %v194_v3 }
  0xc9   : > { %v193_v4 = vpop.xlane.xlu0 %192 }
  0xca   : > { %v195_v6 = vmul.f32 0.0078125, %v193_v4 }
  0xcc   : > { %v197_v7 = vsub.f32 %v195_v6, %v196_v5 }
  0xce   : > { %v198_v8 = vmax.f32 %v197_v7, 0.0 }
  0xd0   : > { %v200_v9 = vadd.f32 1e-07, %v198_v8 }
  0xd2   : > { %362 = vrsqrt.f32 %v200_v9 }
  0xdc   : > { %v363_v11 = vpop.eup %362 }
  0xdd   : > { %v202_v13 = vmul.f32 %v363_v11, %v199_v10 }
  0xdf   : > { %v209_v15 = vadd.f32 %v310_v12, %v202_v13 }
  0xe1   : > { %v216_v16 = vmul.f32 %v311_v14, %v209_v15 }
  0xe3   : > { %217 = vst [vmem:[%s185_s10] sm:$0xff] %v216_v16 }
  0xe4   : > { %407 = shalt.err (!%p404_p4)
}
  0xe5   : > { %s408_s29 = scalar_lea.hbm %s607_s20, 128  ;;  %s412_s9 = scalar_lea.hbm %s654_s3, 256 }
  0xe6   : > { %p409_p5 = scmp.ne.s32.totalorder %s607_s20, %s408_s29  ;;  %p413_p0 = scmp.lt.u32.totalorder %s607_s20, %s654_s3 }
  0xe7   : > { %p414_p1 = scmp.lt.u32.totalorder %s412_s9, %s408_s29  ;;  %p416_p6 = scmp.lt.u32.totalorder %s408_s29, %s607_s20 }
  0xe8   : > { %p410_p8 = pnand %p409_p5, %p663_p11 }
  0xe9   : > { %p415_p3 = por %p414_p1, %p413_p0 }
  0xea   : > { %p411_p9 = pneg %p410_p8 }
  0xeb   : > { %p417_p12 = por %p416_p6, %p415_p3 }
  0xed   : > { %p418_p13 = pnand %p417_p12, %p411_p9 }
  0xef   : > { %421 = shalt.err (!%p418_p13)
}
  0xf0   : > { %318 = dma.vmem_to_hbm [thread:$0]  (%p663_p11), %s609_s11, 128, %s607_s20, %s219_s22  }
  0xf1 PF: > { %s244_s6 = sand.u32 1, %s448_s12   ;;  %p664_p7 = scmp.ne.s32.totalorder %s659_s25, 0 }
  0xf2   : > { %p665_p10 = scmp.ge.s32.totalorder %s460_s15, 2  ;;  %s245_s7 = scalar_lea.sflag [#allocation4], %s244_s6 }
  0xf4   : > { %p325_p2 = pnand %p665_p10, %p664_p7 }
  0xf6   : > { %443 = dma.done.wait (!%p325_p2), %s245_s7, 128  }
  0xf7   : > { %445 = vsyncadd (!%p325_p2), %s245_s7, 4294967168  ;;  %p16_p4 = scmp.ge.s32.totalorder %s509_s18, 4   ;;  %s666_s12 = smov %s452_s13 }
  0xf8   : > { %s667_s13 = smov %s456_s14  ;;  %s668_s14 = smov %s521_s21 }
  0xf9   : > { %s669_s15 = smov %s509_s18  ;;  %18 = sbr.rel (!%p16_p4) target bundleno = 5 (0x5), region = 77 }
 0x100   :  { %250 = vsyncpa [#allocation3], 1 }
 0x101   :  { %252 = vsyncpa [#allocation3 + $0x1], 1 }
 0x102   :  { %253 = vsyncpa [#allocation4], 1 }
 0x103   :  { %255 = vsyncpa [#allocation4 + $0x1], 1 }

</bundles_post_ra>
